<compile_context>
chip_gen: v5e
topology: v5e:2x2
jax: 0.10.0
libtpu: 0.0.40
codegen_flags: <defaults>
</compile_context>

<pallas_src>
import numpy as np
import jax
import jax.numpy as jnp
from jax.experimental import pallas as pl
from jax.experimental.pallas import tpu as pltpu


def joint_kernel(enc_ref, dec_p_ref, w_enc_ref, b_enc_ref,
                 w_out_ref, b_out_ref, out_ref, joint_sc):
    """One (batch, T-tile, V-tile) grid point.

    enc_ref   : (1, t_tile, D_enc)      compute dtype
    dec_p_ref : (1, U_pad, H)           f32 (precomputed decoder projection)
    w_enc_ref : (D_enc, H)              compute dtype
    b_enc_ref : (1, H)                  f32
    w_out_ref : (H, v_tile)             compute dtype
    b_out_ref : (1, v_tile)             f32
    out_ref   : (1, t_tile*U_pad, v_tile)
    joint_sc  : (t_tile*U_pad, H)       compute dtype VMEM scratch
    """
    t_tile = enc_ref.shape[1]
    u_pad = dec_p_ref.shape[1]
    h = w_enc_ref.shape[1]

    # Encoder projection + broadcast-add + tanh depend only on (b, t):
    # compute on the first V tile and cache the flattened (M, H) matmul LHS.
    # V is the innermost "arbitrary" axis, so the cache is always written
    # before it is read.
    @pl.when(pl.program_id(2) == 0)
    def _():
        enc_p = (jnp.dot(enc_ref[0], w_enc_ref[...],
                         preferred_element_type=jnp.float32)
                 + b_enc_ref[...])                                  # (t_tile, H) f32
        # add in f32, tanh in the compute dtype (bf16 EUP/VPU on v6e/v7x);
        # U_pad % 8 == 0 -> the reshape is layout-preserving (no relayout).
        joint = (enc_p[:, None, :] + dec_p_ref[0][None, :, :]).astype(joint_sc.dtype)
        joint_sc[...] = jnp.tanh(joint.reshape(t_tile * u_pad, h))

    # Output projection: one large-M MXU matmul with f32 accumulation, stored
    # as a sublane/lane-dense 2-D block (unmasked full-width stores).
    out2d = (jnp.dot(joint_sc[...], w_out_ref[...],
                     preferred_element_type=jnp.float32)
             + b_out_ref[...])                                      # (M, v_tile) f32
    out_ref[0] = out2d.astype(out_ref.dtype)


def _round_up(x, m):
    return (x + m - 1) // m * m


def _vmem_limit_bytes():
    # Generation-aware scoped VMEM limit: ~3/4 of physical VMEM
    # (~96 MiB on v5e/v6e, ~48 MiB on v7x). Fallback if query unavailable.
    try:
        cap = int(pltpu.get_tpu_info().vmem_capacity_bytes)
    except Exception:
        cap = 64 * 1024 * 1024
    return max(32 * 1024 * 1024, (cap * 3) // 4)


def _plan_tiles(T, U_pad, V, D_enc, H, c_bytes, o_bytes, vmem_budget,
                t_tile_hint=None, v_tile_hint=None):
    """Pick (t_tile, n_t, v_tile, n_v).

    Prefers the largest M = t_tile*U_pad (amortizes W_out restreaming),
    shrinking v_tile first and then M until the explicit VMEM estimate fits
    the per-generation budget.  T / V extents are rebalanced so padding waste
    is at most one sublane / lane group per tile.
    """
    def balance_t(t_target):
        t_target = max(8, _round_up(int(t_target), 8))
        n_t = pl.cdiv(T, t_target)
        t_tile = max(8, _round_up(pl.cdiv(T, n_t), 8))
        return t_tile, n_t

    def balance_v(v_target):
        v_target = max(128, _round_up(int(v_target), 128))
        n_v = pl.cdiv(_round_up(V, 128), v_target)
        v_tile = max(128, _round_up(pl.cdiv(V, n_v), 128))
        return v_tile, n_v

    def vmem_bytes(t_tile, v_tile):
        m = t_tile * U_pad
        return (m * H * c_bytes                     # joint_sc scratch
                + 2 * m * v_tile * o_bytes          # double-buffered out blocks
                + 2 * H * v_tile * c_bytes          # double-buffered w_out blocks
                + 2 * t_tile * D_enc * c_bytes      # double-buffered enc blocks
                + 2 * U_pad * H * 4                 # double-buffered dec_p blocks
                + 2 * D_enc * H * c_bytes           # double-buffered w_enc
                + 2 * (H + v_tile) * 4              # biases
                + m * H * 4                         # f32 add/tanh temporary
                + m * v_tile * 4)                   # f32 matmul result pre-cast

    m_targets = ([t_tile_hint * U_pad] if t_tile_hint is not None
                 else [2048, 1024, 512, 256, 128, 64, 8 * U_pad])
    v_targets = ([v_tile_hint] if v_tile_hint is not None
                 else [512, 256, 128])

    last = None
    for m_t in m_targets:
        t_tile, n_t = balance_t(pl.cdiv(m_t, U_pad))
        for v_t in v_targets:
            v_tile, n_v = balance_v(v_t)
            last = (t_tile, n_t, v_tile, n_v)
            if vmem_bytes(t_tile, v_tile) <= vmem_budget:
                return last
    return last  # nothing fit: smallest combination tried


def joint_network_forward(enc_out, dec_out, params, *,
                          t_tile=None, v_tile=None,
                          compute_dtype=jnp.bfloat16, out_dtype=None):
    """enc_out: (B, T, 1, D_enc), dec_out: (B, 1, U, D_dec) -> (B, T, U, V)."""
    w_enc, b_enc, w_dec, b_dec, w_out, b_out = params
    B, T, _, D_enc = enc_out.shape
    _, _, U, D_dec = dec_out.shape
    H = w_enc.shape[1]
    V = w_out.shape[1]
    # bf16 output by default (the (B,T,U,V) writeback dominates HBM traffic);
    # pass out_dtype=jnp.float32 explicitly if f32 logits are required.
    out_dtype = compute_dtype if out_dtype is None else out_dtype

    enc = enc_out.reshape(B, T, D_enc)          # squeeze broadcast axes
    dec = dec_out.reshape(B, U, D_dec)

    # Decoder projection is identical for every (T, V) tile of a batch
    # element: do it once here (tiny XLA matmul, f32 accumulation).  Pad U to
    # a multiple of 8 so in-kernel reshapes / output blocks are sublane dense;
    # padded rows are sliced off after the kernel.
    U_pad = _round_up(U, 8)
    dec_p = (jnp.einsum('bud,dh->buh',
                        dec.astype(compute_dtype), w_dec.astype(compute_dtype),
                        preferred_element_type=jnp.float32)
             + b_dec.astype(jnp.float32))
    dec_p = jnp.pad(dec_p, ((0, 0), (0, U_pad - U), (0, 0)))

    # --- tile plan (function of U, generation-aware VMEM budget) ------------
    c_bytes = np.dtype(compute_dtype).itemsize
    o_bytes = np.dtype(out_dtype).itemsize
    vmem_limit = _vmem_limit_bytes()
    t_tile, n_t, v_tile, n_v = _plan_tiles(
        T, U_pad, V, D_enc, H, c_bytes, o_bytes,
        vmem_budget=int(vmem_limit * 0.8),
        t_tile_hint=t_tile, v_tile_hint=v_tile)

    # Even "parallel" grid extent so v7x's 2 TensorCores split evenly, when it
    # is nearly free (no pure-padding tile, <= one extra sublane group).
    if (B * n_t) % 2 == 1:
        cand_n_t = n_t + 1
        cand_t_tile = max(8, _round_up(pl.cdiv(T, cand_n_t), 8))
        if (cand_n_t * cand_t_tile - T < cand_t_tile
                and cand_n_t * cand_t_tile - T <= (n_t * t_tile - T) + 8):
            n_t, t_tile = cand_n_t, cand_t_tile

    T_pad = n_t * t_tile
    V_pad = n_v * v_tile
    M = t_tile * U_pad

    # --- padded / casted operands (padded vocab cols & bias entries = 0) ----
    enc_pad = jnp.pad(enc, ((0, 0), (0, T_pad - T), (0, 0))).astype(compute_dtype)
    w_enc_c = w_enc.astype(compute_dtype)
    b_enc2 = b_enc.reshape(1, H).astype(jnp.float32)
    w_out_c = jnp.pad(w_out, ((0, 0), (0, V_pad - V))).astype(compute_dtype)
    b_out2 = jnp.pad(b_out, (0, V_pad - V)).reshape(1, V_pad).astype(jnp.float32)

    grid_spec = pltpu.PrefetchScalarGridSpec(
        num_scalar_prefetch=0,
        grid=(B, n_t, n_v),
        in_specs=[
            pl.BlockSpec((1, t_tile, D_enc), lambda b, t, v: (b, t, 0)),
            pl.BlockSpec((1, U_pad, H),      lambda b, t, v: (b, 0, 0)),
            pl.BlockSpec((D_enc, H),         lambda b, t, v: (0, 0)),
            pl.BlockSpec((1, H),             lambda b, t, v: (0, 0)),
            pl.BlockSpec((H, v_tile),        lambda b, t, v: (0, v)),
            pl.BlockSpec((1, v_tile),        lambda b, t, v: (0, v)),
        ],
        # Flat (M, v_tile) output block: sublane- and lane-dense -> unmasked
        # full stores, no in-kernel 3-D reshape of the matmul result.
        out_specs=pl.BlockSpec((1, M, v_tile), lambda b, t, v: (b, t, v)),
        scratch_shapes=[pltpu.VMEM((M, H), compute_dtype)],
    )

    out_flat = pl.pallas_call(
        joint_kernel,
        out_shape=jax.ShapeDtypeStruct((B, T_pad * U_pad, V_pad), out_dtype),
        grid_spec=grid_spec,
        compiler_params=pltpu.CompilerParams(
            dimension_semantics=("parallel", "parallel", "arbitrary"),
            vmem_limit_bytes=vmem_limit),
    )(enc_pad, dec_p, w_enc_c, b_enc2, w_out_c, b_out2)

    out = out_flat.reshape(B, T_pad, U_pad, V_pad)
    return out[:, :T, :U, :V]


def init_params(key, d_enc, d_dec, joint_space, joint_out):
    """Deterministic synthetic parameters.

    PyTorch Linear stores weight as (out, in); we pre-transpose to (in, out)
    so the kernel does plain x @ W.
    """
    ks = jax.random.split(key, 6)
    w_enc = jax.random.normal(ks[0], (d_enc, joint_space), jnp.float32) * 0.05
    b_enc = jax.random.normal(ks[1], (joint_space,), jnp.float32) * 0.05
    w_dec = jax.random.normal(ks[2], (d_dec, joint_space), jnp.float32) * 0.05
    b_dec = jax.random.normal(ks[3], (joint_space,), jnp.float32) * 0.05
    w_out = jax.random.normal(ks[4], (joint_space, joint_out), jnp.float32) * 0.05
    b_out = jax.random.normal(ks[5], (joint_out,), jnp.float32) * 0.05
    return w_enc, b_enc, w_dec, b_dec, w_out, b_out


def joint_network_ref(enc_out, dec_out, params):
    w_enc, b_enc, w_dec, b_dec, w_out, b_out = params
    e = jnp.einsum('btxd,dh->btxh', enc_out, w_enc) + b_enc   # (B,T,1,H)
    d = jnp.einsum('bxud,dh->bxuh', dec_out, w_dec) + b_dec   # (B,1,U,H)
    j = jnp.tanh(e + d)                                       # (B,T,U,H)
    return jnp.einsum('btuh,hv->btuv', j, w_out) + b_out      # (B,T,U,V)


if __name__ == "__main__":
    # Small shapes that still exercise T tiling (2 T-tiles), V tiling
    # (V=200 -> 2 lane-dense 128-wide V-tiles) and U padding (U=6 -> U_pad=8).
    B, T, U = 2, 16, 6
    D_ENC, D_DEC = 32, 32
    JOINT_SPACE, JOINT_OUT = 32, 200

    key = jax.random.PRNGKey(0)
    k_enc, k_dec, k_par = jax.random.split(key, 3)

    enc_out = jax.random.normal(k_enc, (B, T, 1, D_ENC), jnp.float32)
    dec_out = jax.random.normal(k_dec, (B, 1, U, D_DEC), jnp.float32)
    params = init_params(k_par, D_ENC, D_DEC, JOINT_SPACE, JOINT_OUT)

    ref = joint_network_ref(enc_out, dec_out, params)

    # Full-precision compute/output path: tight check against the reference.
    out_f32 = jax.block_until_ready(
        joint_network_forward(enc_out, dec_out, params,
                              t_tile=8, v_tile=128,
                              compute_dtype=jnp.float32,
                              out_dtype=jnp.float32))
    assert out_f32.shape == (B, T, U, JOINT_OUT)
    assert jnp.allclose(out_f32, ref, atol=1e-4, rtol=1e-4)

    # Default path: bf16 matmul inputs + bf16 output, f32 accumulation.
    out_bf16 = jax.block_until_ready(
        joint_network_forward(enc_out, dec_out, params,
                              t_tile=8, v_tile=128))
    assert out_bf16.shape == (B, T, U, JOINT_OUT)
    assert out_bf16.dtype == jnp.bfloat16
    assert jnp.allclose(out_bf16.astype(jnp.float32), ref, atol=2e-2, rtol=2e-2)

    # Automatic tile plan (no hints) also runs.
    out_auto = jax.block_until_ready(
        joint_network_forward(enc_out, dec_out, params))
    assert out_auto.shape == (B, T, U, JOINT_OUT)
    assert jnp.allclose(out_auto.astype(jnp.float32), ref, atol=2e-2, rtol=2e-2)

    print("KERNEL_OK")
</pallas_src>

<mosaic_0001>
module attributes {stable_mosaic.version = 11 : i64} {
  func.func @joint_kernel(%arg0: i32, %arg1: i32, %arg2: i32, %arg3: memref<1x8x32xf32, #tpu.memory_space<vmem>>, %arg4: memref<1x8x32xf32, #tpu.memory_space<vmem>>, %arg5: memref<32x32xf32, #tpu.memory_space<vmem>>, %arg6: memref<1x32xf32, #tpu.memory_space<vmem>>, %arg7: memref<32x128xf32, #tpu.memory_space<vmem>>, %arg8: memref<1x128xf32, #tpu.memory_space<vmem>>, %arg9: memref<1x64x128xf32, #tpu.memory_space<vmem>>, %arg10: memref<64x32xf32, #tpu.memory_space<vmem>>) attributes {dimension_semantics = [#tpu.dimension_semantics<parallel>, #tpu.dimension_semantics<parallel>, #tpu.dimension_semantics<arbitrary>], iteration_bounds = array<i64: 2, 2, 2>, scalar_prefetch = 0 : i64, scratch_operands = 1 : i64, tpu.core_type = #tpu.core_type<tc>, window_params = [{transform_indices = @transform_0, window_bounds = array<i64: 1, 8, 32>}, {transform_indices = @transform_1, window_bounds = array<i64: 1, 8, 32>}, {pipeline_mode = #tpu.pipeline_mode<synchronous>, transform_indices = @transform_2, window_bounds = array<i64: 32, 32>}, {pipeline_mode = #tpu.pipeline_mode<synchronous>, transform_indices = @transform_3, window_bounds = array<i64: 1, 32>}, {transform_indices = @transform_4, window_bounds = array<i64: 32, 128>}, {transform_indices = @transform_5, window_bounds = array<i64: 1, 128>}, {transform_indices = @transform_6, window_bounds = array<i64: 1, 64, 128>}]} {
    %c0_i32 = arith.constant 0 : i32
    %0 = arith.cmpi eq, %arg2, %c0_i32 : i32
    %1 = arith.extui %0 : i1 to i32
    %c0_i32_0 = arith.constant 0 : i32
    %2 = arith.cmpi ne, %1, %c0_i32_0 : i32
    scf.if %2 {
      %c0_9 = arith.constant 0 : index
      %c0_10 = arith.constant 0 : index
      %c0_11 = arith.constant 0 : index
      %12 = vector.load %arg3[%c0_9, %c0_10, %c0_11] : memref<1x8x32xf32, #tpu.memory_space<vmem>>, vector<1x8x32xf32>
      %13 = vector.shape_cast %12 : vector<1x8x32xf32> to vector<8x32xf32>
      %c0_12 = arith.constant 0 : index
      %c0_13 = arith.constant 0 : index
      %14 = vector.load %arg5[%c0_12, %c0_13] : memref<32x32xf32, #tpu.memory_space<vmem>>, vector<32x32xf32>
      %cst_14 = arith.constant dense<0.000000e+00> : vector<8x32xf32>
      %15 = tpu.matmul %13, %14, %cst_14 {dimension_numbers = #tpu.dot_dimension_numbers<[1], [0], [0], [1], [0, 0, 1, 1], [], []>} : vector<8x32xf32>, vector<32x32xf32>, vector<8x32xf32> -> vector<8x32xf32>
      %c0_15 = arith.constant 0 : index
      %c0_16 = arith.constant 0 : index
      %16 = vector.load %arg6[%c0_15, %c0_16] : memref<1x32xf32, #tpu.memory_space<vmem>>, vector<1x32xf32>
      %17 = vector.broadcast %16 : vector<1x32xf32> to vector<8x32xf32>
      %18 = arith.addf %15, %17 : vector<8x32xf32>
      %19 = vector.shape_cast %18 : vector<8x32xf32> to vector<8x1x32xf32>
      %c0_17 = arith.constant 0 : index
      %c0_18 = arith.constant 0 : index
      %c0_19 = arith.constant 0 : index
      %20 = vector.load %arg4[%c0_17, %c0_18, %c0_19] : memref<1x8x32xf32, #tpu.memory_space<vmem>>, vector<1x8x32xf32>
      %21 = vector.shape_cast %20 : vector<1x8x32xf32> to vector<8x32xf32>
      %22 = vector.shape_cast %21 : vector<8x32xf32> to vector<1x8x32xf32>
      %23 = vector.broadcast %19 : vector<8x1x32xf32> to vector<8x8x32xf32>
      %24 = vector.broadcast %22 : vector<1x8x32xf32> to vector<8x8x32xf32>
      %25 = arith.addf %23, %24 : vector<8x8x32xf32>
      %26 = vector.shape_cast %25 : vector<8x8x32xf32> to vector<64x32xf32>
      %27 = math.tanh %26 : vector<64x32xf32>
      %c0_20 = arith.constant 0 : index
      %c0_21 = arith.constant 0 : index
      %28 = vector.load %arg10[%c0_20, %c0_21] : memref<64x32xf32, #tpu.memory_space<vmem>>, vector<64x32xf32>
      tpu.vector_store %arg10[%c0_20, %c0_21], %27 {strides = array<i32>} : memref<64x32xf32, #tpu.memory_space<vmem>>, vector<64x32xf32>,
    } else {
    }
    %c0 = arith.constant 0 : index
    %c0_1 = arith.constant 0 : index
    %3 = vector.load %arg10[%c0, %c0_1] : memref<64x32xf32, #tpu.memory_space<vmem>>, vector<64x32xf32>
    %c0_2 = arith.constant 0 : index
    %c0_3 = arith.constant 0 : index
    %4 = vector.load %arg7[%c0_2, %c0_3] : memref<32x128xf32, #tpu.memory_space<vmem>>, vector<32x128xf32>
    %cst = arith.constant dense<0.000000e+00> : vector<64x128xf32>
    %5 = tpu.matmul %3, %4, %cst {dimension_numbers = #tpu.dot_dimension_numbers<[1], [0], [0], [1], [0, 0, 1, 1], [], []>} : vector<64x32xf32>, vector<32x128xf32>, vector<64x128xf32> -> vector<64x128xf32>
    %c0_4 = arith.constant 0 : index
    %c0_5 = arith.constant 0 : index
    %6 = vector.load %arg8[%c0_4, %c0_5] : memref<1x128xf32, #tpu.memory_space<vmem>>, vector<1x128xf32>
    %7 = vector.broadcast %6 : vector<1x128xf32> to vector<64x128xf32>
    %8 = arith.addf %5, %7 : vector<64x128xf32>
    %c0_6 = arith.constant 0 : index
    %c0_7 = arith.constant 0 : index
    %c0_8 = arith.constant 0 : index
    %9 = vector.load %arg9[%c0_6, %c0_7, %c0_8] : memref<1x64x128xf32, #tpu.memory_space<vmem>>, vector<1x64x128xf32>
    %10 = vector.shape_cast %9 : vector<1x64x128xf32> to vector<64x128xf32>
    %11 = vector.shape_cast %8 : vector<64x128xf32> to vector<1x64x128xf32>
    tpu.vector_store %arg9[%c0_6, %c0_7, %c0_8], %11 {strides = array<i32>} : memref<1x64x128xf32, #tpu.memory_space<vmem>>, vector<1x64x128xf32>,
    return
  }
  func.func @transform_0(%arg0: i32, %arg1: i32, %arg2: i32) -> (i32, i32, i32) {
    %c0_i32 = arith.constant 0 : i32
    %c0_i32_0 = arith.constant 0 : i32
    return %arg0, %arg1, %c0_i32 : i32, i32, i32
  }
  func.func @transform_1(%arg0: i32, %arg1: i32, %arg2: i32) -> (i32, i32, i32) {
    %c0_i32 = arith.constant 0 : i32
    %c0_i32_0 = arith.constant 0 : i32
    %c0_i32_1 = arith.constant 0 : i32
    return %arg0, %c0_i32, %c0_i32_0 : i32, i32, i32
  }
  func.func @transform_2(%arg0: i32, %arg1: i32, %arg2: i32) -> (i32, i32) {
    %c0_i32 = arith.constant 0 : i32
    %c0_i32_0 = arith.constant 0 : i32
    %c0_i32_1 = arith.constant 0 : i32
    return %c0_i32, %c0_i32_0 : i32, i32
  }
  func.func @transform_3(%arg0: i32, %arg1: i32, %arg2: i32) -> (i32, i32) {
    %c0_i32 = arith.constant 0 : i32
    %c0_i32_0 = arith.constant 0 : i32
    %c0_i32_1 = arith.constant 0 : i32
    return %c0_i32, %c0_i32_0 : i32, i32
  }
  func.func @transform_4(%arg0: i32, %arg1: i32, %arg2: i32) -> (i32, i32) {
    %c0_i32 = arith.constant 0 : i32
    %c0_i32_0 = arith.constant 0 : i32
    return %c0_i32, %arg2 : i32, i32
  }
  func.func @transform_5(%arg0: i32, %arg1: i32, %arg2: i32) -> (i32, i32) {
    %c0_i32 = arith.constant 0 : i32
    %c0_i32_0 = arith.constant 0 : i32
    return %c0_i32, %arg2 : i32, i32
  }
  func.func @transform_6(%arg0: i32, %arg1: i32, %arg2: i32) -> (i32, i32, i32) {
    %c0_i32 = arith.constant 0 : i32
    return %arg0, %arg1, %arg2 : i32, i32, i32
  }
}

</mosaic_0001>

<bundles_post_ra>
// kernel: tpu_custom_call.1
= control target key start
LH: loop header
LB: loop body
LE: loop exit
PB: predicated region body
PF: predicated region fallthrough
CT: control target
= control target key end

     0   :  { %s1814_s0 = inlined_call_operand.hbm [shape: f32[2,16,32], index: 0, kind: input, shape index: {}]   ;;  %s1815_s1 = inlined_call_operand.hbm [shape: f32[2,8,32], index: 1, kind: input, shape index: {}]   ;;  %s1816_s2 = inlined_call_operand.hbm [shape: f32[32,32], index: 2, kind: input, shape index: {}]   ;;  %s1817_s3 = inlined_call_operand.vmem [shape: f32[1,32], index: 3, kind: input, shape index: {}]   ;;  %s1818_s4 = inlined_call_operand.hbm [shape: f32[32,256], index: 4, kind: input, shape index: {}]   ;;  %s1819_s5 = inlined_call_operand.vmem [shape: f32[1,256], index: 5, kind: input, shape index: {}]   ;;  %s1820_s6 = inlined_call_operand.hbm [shape: f32[2,128,256], index: 6, kind: output, shape index: {}]  }
   0x1   :  { %1844 = sst [smem:[#allocation37_spill]] %s1814_s0 }
   0x2   :  { %1845 = sst [smem:[#allocation38_spill]] %s1816_s2 }
   0x3   :  { %1846 = sst [smem:[#allocation39_spill]] %s1817_s3 }
   0x4   :  { %1847 = sst [smem:[#allocation40_spill]] %s1819_s5 }
   0x5   :  { %1848 = sst [smem:[#allocation41_spill]] %s1820_s6 }
   0x6   :  { %11 = vsyncpa [#allocation4], 0 }
   0x7   :  { %13 = vsyncpa [#allocation4 + $0x1], 0 }
   0x8   :  { %14 = vsyncpa [#allocation7], 0 }
   0x9   :  { %16 = vsyncpa [#allocation7 + $0x1], 0 }
   0xa   :  { %17 = vsyncpa [#allocation10], 0 }
   0xb   :  { %19 = vsyncpa [#allocation10 + $0x1], 0 }
   0xc   :  { %20 = vsyncpa [#allocation5], 0 }
   0xd   :  { %22 = vsyncpa [#allocation5 + $0x1], 0  ;;  %s1384_s21 = smov 0   ;;  %s1386_s22 = smov 0  }
   0xe   :  { %s1388_s23 = smov 0   ;;  %s1390_s24 = smov 0  }
   0xf   :  { %s1392_s25 = smov 0   ;;  %s1394_s26 = smov 0  }
  0x10   :  { %s1396_s27 = smov 0   ;;  %s1398_s28 = smov 0  }
  0x11   :  { %s1400_s29 = smov 0   ;;  %s1402_s30 = smov 0  }
  0x12   :  { %s1404_s7 = smov 0   ;;  %s1406_s8 = smov 0  }
  0x13   :  { %s1408_s9 = smov 0   ;;  %s1410_s10 = smov 0  }
  0x14   :  { %s1412_s11 = smov 0   ;;  %s1414_s12 = smov 0  }
  0x15   :  { %s1416_s13 = smov 0   ;;  %s1418_s14 = smov 0  }
  0x16   :  { %s1420_s15 = smov 0  }
  0x17 LB: > { %1849 = sst [smem:[#allocation17_spill]] %s1268_s21  ;;  %s1480_s16 = sadd.s32 4294967295, %s1340_s15   ;;  %s1340_s15 = sphi %s1420_s15, %s28_s15   ;;  %s1336_s14 = sphi %s1418_s14, %s1928_s14   ;;  %s1332_s13 = sphi %s1416_s13, %s1927_s13   ;;  %s1328_s12 = sphi %s1414_s12, %s1926_s12   ;;  %s1324_s11 = sphi %s1412_s11, %s1914_s11   ;;  %s1320_s10 = sphi %s1410_s10, %s1913_s10   ;;  %s1316_s9 = sphi %s1408_s9, %s1925_s9   ;;  %s1312_s8 = sphi %s1406_s8, %s1912_s8   ;;  %s1308_s7 = sphi %s1404_s7, %s1924_s7   ;;  %s1304_s30 = sphi %s1402_s30, %s1923_s30   ;;  %s1300_s29 = sphi %s1400_s29, %s1910_s29   ;;  %s1296_s28 = sphi %s1398_s28, %s1922_s28   ;;  %s1292_s27 = sphi %s1396_s27, %s1921_s27   ;;  %s1288_s26 = sphi %s1394_s26, %s1920_s26   ;;  %s1284_s25 = sphi %s1392_s25, %s1919_s25   ;;  %s1280_s24 = sphi %s1390_s24, %s1918_s24   ;;  %s1276_s23 = sphi %s1388_s23, %s1907_s23   ;;  %s1272_s22 = sphi %s1386_s22, %s1906_s22   ;;  %s1268_s21 = sphi %s1384_s21, %s1905_s21  }
  0x18   : > { %1850 = sst [smem:[#allocation18_spill]] %s1272_s22  ;;  %p765_p0 = scmp.ge.s32.totalorder %s1340_s15, 1 }
  0x19   : > { %1851 = sst [smem:[#allocation19_spill]] %s1276_s23  ;;  %p1831_p1 = scmp.eq.s32.totalorder %s1480_s16, 0 }
  0x1a   : > { %1852 = sst [smem:[#allocation20_spill]] %s1300_s29  ;;  %p217_p2 = scmp.eq.s32.totalorder %s1480_s16, 7 }
  0x1b   : > { %1853 = sst [smem:[#allocation21_spill]] %s1312_s8  ;;  %p230_p3 = scmp.lt.s32.totalorder %s1340_s15, 9 }
  0x1c   : > { %1854 = sst [smem:[#allocation22_spill]] %s1316_s9  ;;  %s1342_s6 = smov [#allocation8]  }
  0x1d   : > { %1855 = sst [smem:[#allocation23_spill]] %s1320_s10  ;;  %p1489_p4 = pnand %p765_p0, %p230_p3 }
  0x1e   : > { %1856 = sst [smem:[#allocation24_spill]] %s1324_s11  ;;  %s243_s11 = sshll.u32 %s1342_s6, 4  ;;  %s244_s11 = int_to_ptr.vmem [resolvable:$true] %s243_s11 }
  0x1f   : > { %1857 = sst [smem:[#allocation25_spill]] %s1332_s13  ;;  %p823_p5 = pneg %p1489_p4 }
  0x20   : > { %1858 = sst [smem:[#allocation26_spill]] %s1336_s14  ;;  %s1822_s17 = smov 128  }
  0x21   : > { %s1859_s2 = sld [smem:[#allocation38_spill]]  ;;  %p824_p6 = pnand %p823_p5, %p1831_p1 }
  0x22   : > { %s1823_s18 = smov 8   ;;  %s40_s6 = sadd.s32 1, %s1328_s12 }
  0x23   : > { %p41_p7 = scmp.ge.s32.totalorder %s40_s6, 2  ;;  %s43_s10 = sadd.s32 1, %s1332_s13 }
  0x24   : > { %s47_s3 = sadd.s32 1, %s1336_s14  ;;  %s56_s5 = sadd.s32 1, %s1312_s8 }
  0x25   : > { %s1930_s6 = smov (%p41_p7, %s40_s6), 0  ;;  %s1932_s10 = smov (!%p41_p7, %s43_s10), %s1332_s13 }
  0x26   : > { %1861 = sst [smem:[#allocation27_spill]] %s1930_s6  ;;  %p63_p8 = scmp.ne.s32.totalorder %s1312_s8, %s1308_s7 }
  0x27   : > { %s241_s19 = sshll.u32 %s1859_s2, 4  ;;  %p1830_p9 = scmp.eq.s32.totalorder %s1340_s15, 0  ;;  %s242_s19 = int_to_ptr.hbm [resolvable:$true] %s241_s19 }
  0x28   : > { %826 = dma.hbm_to_vmem [thread:$0]  (!%p824_p6), %s242_s19, 512, %s244_s11, [#allocation7], %s1822_s17, %s1822_s17, %s1823_s18  }
  0x29   : > { %p45_p10 = scmp.ge.s32.totalorder %s1932_s10, 2  ;;  %p69_p11 = scmp.ne.s32.totalorder %s1308_s7, %s1304_s30 }
  0x2a   : > { %p1515_p12 = por %p1830_p9, %p63_p8  ;;  %s147_s19 = ssub.s32 %s1328_s12, %s1930_s6 }
  0x2b   : > { %s1934_s10 = smov (%p45_p10, %s1932_s10), 0  ;;  %s1936_s3 = smov (!%p45_p10, %s47_s3), %s1336_s14 }
  0x2c   : > { %1863 = sst [smem:[#allocation28_spill]] %s1934_s10  ;;  %s52_s17 = ssub.s32 %s1332_s13, %s1934_s10 }
  0x2d   : > { %p1528_p13 = por %p1831_p1, %p69_p11  ;;  %p49_p0 = scmp.ge.s32.totalorder %s1936_s3, 2 }
  0x2e   : > { %p148_p3 = scmp.eq.s32.totalorder %s147_s19, 0  ;;  %s150_s30 = sadd.s32 1, %s1288_s26 }
  0x2f   : > { %s1864_s18 = scalar_select %p1528_p13, 1, 0 }
  0x30   : > { %p157_p5 = scmp.ne.s32.totalorder %s1288_s26, %s1284_s25  ;;  %s1938_s3 = smov (%p49_p0, %s1936_s3), 0 }
  0x31   : > { %1865 = sst [smem:[#allocation29_spill]] %s1864_s18  ;;  %s1542_s10 = ssub.s32 %s1336_s14, %s1938_s3 }
  0x32   : > { %1866 = sst [smem:[#allocation30_spill]] %s1938_s3  ;;  %p1546_p6 = por %p157_p5, %p1830_p9 }
  0x33   : > { %s1538_s2 = scalar_select %p148_p3, %s1288_s26, %s150_s30  }
  0x34   : > { %s53_s9 = sor.u32 %s52_s17, %s1542_s10  ;;  %p80_p7 = scmp.eq.s32.totalorder %s1542_s10, 0 }
  0x35   : > { %1867 = sst [smem:[#allocation31_spill]] %s1538_s2  ;;  %p54_p8 = scmp.eq.s32.totalorder %s53_s9, 0 }
  0x36   : > { %p163_p10 = scmp.ne.s32.totalorder %s1284_s25, %s1280_s24  ;;  %s203_s30 = sor.u32 %s147_s19, %s53_s9 }
  0x37   : > { %s206_s2 = sadd.s32 1, %s1276_s23  ;;  %p204_p0 = scmp.eq.s32.totalorder %s203_s30, 0 }
  0x38   : > { %s1556_s18 = scalar_select %p54_p8, %s1312_s8, %s56_s5  }
  0x39   : > { %p1560_p11 = por %p163_p10, %p1831_p1  ;;  %p216_p3 = scmp.ne.s32.totalorder %s1276_s23, %s1272_s22 }
  0x3a   : > { %1869 = sst [smem:[#allocation32_spill]] %s1556_s18  ;;  %p222_p5 = scmp.ne.s32.totalorder %s1272_s22, %s1268_s21 }
  0x3b   : > { %s1569_s17 = scalar_select %p204_p0, %s1276_s23, %s206_s2  }
  0x3c   : > { %p1573_p9 = por %p217_p2, %p216_p3  ;;  %s1874_s9 = sadd.s32 4294967294, %s1340_s15  }
  0x3d   : > { %1871 = sst [smem:[#allocation33_spill]] %s1569_s17  ;;  %p223_p8 = scmp.eq.s32.totalorder %s1874_s9, 7 }
  0x3e   : > { %s1872_s24 = scalar_select %p1573_p9, 1, 0 }
  0x3f   : > { %p1838_p10 = scmp.lt.s32.totalorder %s1340_s15, 8  ;;  %s260_s5 = sand.u32 1, %s1312_s8  }
  0x40   : > { %1873 = sst [smem:[#allocation34_spill]] %s1872_s24  ;;  %p1581_p1 = por %p223_p8, %p222_p5 }
  0x41   : > { %s768_s2 = sshll.u32 %s260_s5, 3  ;;  %s769_s30 = sshll.u32 %s1336_s14, 1 }
  0x42   : > { %s1875_s19 = scalar_select %p1581_p1, 1, 0 }
  0x43   : > { %s268_s18 = sadd.s32 %s1332_s13, %s769_s30  ;;  %s264_s9 = scalar_lea.vmem [#allocation3], %s768_s2 }
  0x44   : > { %1876 = sst [smem:[#allocation35_spill]] %s1875_s19  ;;  %s770_s17 = sshll.u32 %s268_s18, 3 }
  0x45   : > { %s274_s8 = sshll.u32 %s264_s9, 4  ;;  %s1877_s0 = sld [smem:[#allocation37_spill]]  ;;  %s275_s8 = int_to_ptr.vmem [resolvable:$true] %s274_s8 }
  0x46   : > { %p828_p2 = pnand %p1838_p10, %p1515_p12  ;;  %p1598_p0 = pnand %p1838_p10, %p1546_p6 }
  0x47   : > { %s261_s2 = scalar_lea.sflag [#allocation4], %s260_s5  ;;  %s82_s30 = sadd.s32 1, %s1300_s29 }
  0x48   : > { %p89_p3 = scmp.ne.s32.totalorder %s1300_s29, %s1296_s28  ;;  %p1880_p5 = scmp.eq.s32.totalorder %s1340_s15, 0 }
  0x49   : > { %s1608_s21 = scalar_select %p80_p7, %s1300_s29, %s82_s30  }
  0x4a   : > { %p1612_p8 = por %p89_p3, %p1880_p5  ;;  %p95_p12 = scmp.ne.s32.totalorder %s1296_s28, %s1292_s27 }
  0x4b   : > { %s270_s19 = scalar_lea.hbm %s1877_s0, %s770_s17  ;;  %1879 = sst [smem:[#allocation36_spill]] %s1608_s21 }
  0x4c   : > { %s272_s24 = sshll.u32 %s270_s19, 4  ;;  %s281_s6 = sand.u32 1, %s1340_s15   ;;  %s273_s24 = int_to_ptr.hbm [resolvable:$true] %s272_s24 }
  0x4d   : > { %830 = dma.hbm_to_vmem [thread:$0]  (!%p828_p2), %s273_s24, 128, %s275_s8, %s261_s2  }
  0x4e   : > { %s283_s11 = sand.u32 1, %s1300_s29   ;;  %p1882_p6 = scmp.eq.s32.totalorder %s1480_s16, 0 }
  0x4f   : > { %s771_s17 = sshll.u32 %s283_s11, 3  ;;  %s772_s10 = sshll.u32 %s1336_s14, 3 }
  0x50   : > { %p1622_p10 = por %p95_p12, %p1882_p6  ;;  %s289_s19 = scalar_lea.hbm %s1815_s1, %s772_s10 }
  0x51   : > { %s291_s9 = sshll.u32 %s289_s19, 4  ;;  %s285_s2 = scalar_lea.vmem [#allocation6], %s771_s17  ;;  %s292_s9 = int_to_ptr.hbm [resolvable:$true] %s291_s9 }
  0x52   : > { %s293_s30 = sshll.u32 %s285_s2, 4  ;;  %p1884_p7 = scmp.lt.s32.totalorder %s1340_s15, 8  ;;  %s294_s30 = int_to_ptr.vmem [resolvable:$true] %s293_s30 }
  0x53   : > { %s300_s27 = sand.u32 1, %s1288_s26   ;;  %s282_s13 = scalar_lea.sflag [#allocation7], %s281_s6 }
  0x54   : > { %p831_p2 = pnand %p1884_p7, %p1612_p8  ;;  %s773_s0 = sshll.u32 %s300_s27, 5 }
  0x55   : > { %s774_s21 = sshll.u32 %s1328_s12, 3  ;;  %s304_s11 = scalar_lea.vmem [#allocation9], %s773_s0 }
  0x56   : > { %833 = dma.hbm_to_vmem [thread:$0]  (!%p831_p2), %s292_s9, 128, %s294_s30, %s282_s13  }
  0x57   : > { %s311_s14 = sshll.u32 %s304_s11, 4  ;;  %s308_s10 = scalar_lea.hbm %s1818_s4, %s774_s21  ;;  %s312_s14 = int_to_ptr.vmem [resolvable:$true] %s311_s14 }
  0x58   : > { %s309_s17 = sshll.u32 %s308_s10, 4  ;;  %s301_s24 = scalar_lea.sflag [#allocation10], %s300_s27  ;;  %s310_s17 = int_to_ptr.hbm [resolvable:$true] %s309_s17 }
  0x59   : > { %s1345_s5 = smov 256   ;;  %s1885_s23 = smov 8  }
  0x5a   : > { %s1886_s19 = smov 128   ;;  %329 = sbr.rel (%p1489_p4) target bundleno = 434 (0x1b2), region = 44 }
  0x5b   : > { %836 = dma.hbm_to_vmem [thread:$0]  (!%p1598_p0), %s310_s17, 512, %s312_s14, %s301_s24, %s1345_s5, %s1886_s19, %s1885_s23  }
  0x5c   : > { %s331_s0 = sand.u32 (!%p1489_p4), 1, %s1308_s7  }
  0x5d   : > { %s1646_s6 = sshll.u32 (!%p1489_p4), %s331_s0, 3  ;;  %s332_s22 = scalar_lea.sflag (!%p1489_p4), [#allocation4], %s331_s0 }
  0x5e   : > { %s335_s29 = scalar_lea.vmem (!%p1489_p4), [#allocation3], %s1646_s6 }
  0x5f   : > { %1247 = dma.done.wait (%p1528_p13), %s332_s22, 128  }
  0x60   : > { %1249 = vsyncadd (%p1528_p13), %s332_s22, 4294967168  ;;  %s341_s14 = sand.u32 1, %s1480_s16   ;;  %s343_s18 = sand.u32 1, %s1296_s28  }
  0x61   : > { %s1655_s20 = sshll.u32 %s343_s18, 3  ;;  %s342_s21 = scalar_lea.sflag [#allocation7], %s341_s14 }
  0x62   : > { %s345_s9 = scalar_lea.vmem [#allocation6], %s1655_s20 }
  0x63   : > { %1251 = dma.done.wait (%p1622_p10), %s342_s21, 128  }
  0x64   : > { %1253 = vsyncadd (%p1622_p10), %s342_s21, 4294967168  ;;  %p1888_p4 = scmp.eq.s32.totalorder %s1480_s16, 0 }
  0x66   : > { %1255 = dma.done.wait (%p1888_p4), [#allocation7], 512   ;;  %p1889_p13 = pmov %p1888_p4 }
  0x67   : > { %s356_s2 = sand.u32 1, %s1284_s25  }
  0x68   : > { %1257 = vsyncadd (%p1889_p13), [#allocation7], 4294966784  ;;  %s779_s30 = sshll.u32 %s356_s2, 5  ;;  %s357_s27 = scalar_lea.sflag [#allocation10], %s356_s2 }
  0x69   : > { %s1667_s11 = scalar_lea.vmem [#allocation9], %s779_s30 }
  0x6a   : > { %1259 = dma.done.wait (%p1560_p11), %s357_s27, 512  }
  0x6b   : > { %1261 = vsyncadd (%p1560_p11), %s357_s27, 4294966784  ;;  %s1890_s8 = sld [smem:[#allocation18_spill]] }
  0x6c   : > { %s1891_s10 = sld [smem:[#allocation22_spill]] }
  0x6d   : > { %s1892_s19 = sld [smem:[#allocation40_spill]] }
  0x71   : > { %s400_s17 = sand.u32 1, %s1890_s8  }
  0x72   : > { %p403_p10 = scmp.lt.s32.totalorder %s1891_s10, 1  ;;  %s780_s16 = sshll.u32 %s400_s17, 6 }
  0x73   : > { %s1684_s0 = scalar_lea.vmem [#allocation11], %s780_s16  ;;  %p781_p0 = scmp.ne.s32.totalorder %s1891_s10, 0 }
  0x74   : > { %s1678_s24 = scalar_select %p403_p10, %s1891_s10, 1 }
  0x75   : > { %410 = sbr.rel (%p781_p0) target bundleno = 278 (0x116), region = 64  ;;  %s1893_s14 = sld [smem:[#allocation39_spill]] (!%p781_p0) }
  0x76   : > { %s405_s13 = scalar_lea.vmem %s1892_s19, %s1678_s24 }
  0x7a   : > { %v415_v0 = vld [vmem:[#allocation8 + $0x18] sm:$0xff]  ;;  %v414_v1 = vld [vmem:[#allocation8 + $0x10] sm:$0xff]  ;;  %v413_v2 = vld [vmem:[#allocation8 + $0x8] sm:$0xff]  ;;  %vm420_vm0 = vcmask 261120  }
  0x7b   : > { %436 = vmatpush.msra.mxu0 %v415_v0  ;;  %v412_v3 = vld [vmem:[#allocation8] sm:$0xff]  ;;  %v452_v12 = vld [vmem:[%s345_s9] sm:$0xff] }
  0x7c   : > { %v411_v4 = vld [vmem:[%s335_s29] sm:$0xff] }
  0x7d   : > { %437 = vmatpush.msra.mxu0 %v414_v1  ;;  %v1004_v5 = vld [vmem:[%s1893_s14] ss:$0 sm:$0xff] }
  0x7f   : > { %438 = vmatpush.msra.mxu0 %v413_v2 }
  0x81   : > { %439 = vmatpush.msra.mxu0 %v412_v3 }
  0x82   : > { %782 = vmatmul.msk.f32.vlgmr.msra.gmra.mxu0 %vm420_vm0, %v411_v4 }
  0xff   : > { %v441_v6 = vpop.f32.mrf.mxu0 }
 0x100   : > { %v442_v7 = vadd.f32 %v1004_v5, %v441_v6 }
 0x102   : > { %v445_v8 = vrot.slane %v442_v7, 1  ;;  %v446_v9 = vrot.slane %v442_v7, 2  ;;  %v447_v10 = vrot.slane %v442_v7, 3  ;;  %v448_v11 = vrot.slane %v442_v7, 4 }
 0x103   : > { %v449_v13 = vrot.slane %v442_v7, 5  ;;  %v450_v14 = vrot.slane %v442_v7, 6  ;;  %v451_v15 = vrot.slane %v442_v7, 7  ;;  %v453_v16 = vperm.slane %v442_v7, 0 }
 0x104   : > { %v454_v17 = vperm.slane %v445_v8, 0  ;;  %v455_v18 = vperm.slane %v446_v9, 0  ;;  %v456_v19 = vperm.slane %v447_v10, 0  ;;  %v457_v20 = vperm.slane %v448_v11, 0 }
 0x105   : > { %v458_v21 = vperm.slane %v449_v13, 0  ;;  %v459_v22 = vperm.slane %v450_v14, 0  ;;  %v469_v23 = vadd.f32 %v453_v16, %v452_v12  ;;  %v460_v24 = vperm.slane %v451_v15, 0 }
 0x106   : > { %v470_v25 = vadd.f32 %v454_v17, %v452_v12  ;;  %v471_v26 = vadd.f32 %v455_v18, %v452_v12  ;;  %v472_v27 = vadd.f32 %v456_v19, %v452_v12  ;;  %v473_v28 = vadd.f32 %v457_v20, %v452_v12 }
 0x107   : > { %1005 = vtanh.f32 %v469_v23  ;;  %v474_v29 = vadd.f32 %v458_v21, %v452_v12  ;;  %v475_v30 = vadd.f32 %v459_v22, %v452_v12  ;;  %v476_v31 = vadd.f32 %v460_v24, %v452_v12 }
 0x108   : > { %1007 = vtanh.f32 %v470_v25 }
 0x109   : > { %1009 = vtanh.f32 %v471_v26 }
 0x10a   : > { %1011 = vtanh.f32 %v472_v27 }
 0x10b   : > { %1013 = vtanh.f32 %v473_v28 }
 0x10c   : > { %1015 = vtanh.f32 %v474_v29 }
 0x10d   : > { %v1006_v32 = vpop.eup %1005  ;;  %1017 = vtanh.f32 %v475_v30 }
 0x10e   : > { %v1008_v33 = vpop.eup %1007  ;;  %1019 = vtanh.f32 %v476_v31  ;;  %485 = vst.msk [vmem:[#allocation2] sm:$0xff] %vm420_vm0, %v1006_v32 }
 0x10f   : > { %v1010_v34 = vpop.eup %1009  ;;  %486 = vst.msk [vmem:[#allocation2 + $0x8] sm:$0xff] %vm420_vm0, %v1008_v33 }
 0x110   : > { %v1012_v35 = vpop.eup %1011  ;;  %487 = vst.msk [vmem:[#allocation2 + $0x10] sm:$0xff] %vm420_vm0, %v1010_v34 }
 0x111   : > { %v1014_v36 = vpop.eup %1013  ;;  %488 = vst.msk [vmem:[#allocation2 + $0x18] sm:$0xff] %vm420_vm0, %v1012_v35 }
 0x112   : > { %v1016_v37 = vpop.eup %1015  ;;  %489 = vst.msk [vmem:[#allocation2 + $0x20] sm:$0xff] %vm420_vm0, %v1014_v36 }
 0x113   : > { %v1018_v38 = vpop.eup %1017  ;;  %490 = vst.msk [vmem:[#allocation2 + $0x28] sm:$0xff] %vm420_vm0, %v1016_v37 }
 0x114   : > { %v1020_v39 = vpop.eup %1019  ;;  %491 = vst.msk [vmem:[#allocation2 + $0x30] sm:$0xff] %vm420_vm0, %v1018_v38 }
 0x115   : > { %492 = vst.msk [vmem:[#allocation2 + $0x38] sm:$0xff] %vm420_vm0, %v1020_v39 }
 0x116 PF: > { %v504_v40 = vld [vmem:[%s1667_s11 + $0x18] sm:$0xff]  ;;  %v503_v41 = vld [vmem:[%s1667_s11 + $0x10] sm:$0xff]  ;;  %v502_v42 = vld [vmem:[%s1667_s11 + $0x8] sm:$0xff]  ;;  %vm509_vm1 = vcmask 261120   ;;  %s1894_s6 = sld [smem:[#allocation23_spill]]  ;;  %s584_s14 = scalar_lea.sflag [#allocation5], %s400_s17 }
 0x117   : > { %800 = vmatpush.msra.mxu2 %v504_v40  ;;  %801 = vmatpush.msra.mxu3 %v504_v40  ;;  %v501_v43 = vld [vmem:[%s1667_s11] sm:$0xff]  ;;  %v495_v47 = vld [vmem:[#allocation2 + $0x10] sm:$0xff]  ;;  %s1895_s29 = sld [smem:[#allocation22_spill]]  ;;  %v494_v50 = vld [vmem:[#allocation2 + $0x8] sm:$0xff] }
 0x118   : > { %546 = vmatpush.msra.mxu0 %v504_v40  ;;  %799 = vmatpush.msra.mxu1 %v504_v40  ;;  %v493_v46 = vld [vmem:[#allocation2] sm:$0xff]  ;;  %s1896_s18 = sld [smem:[#allocation24_spill]]  ;;  %v496_v51 = vld [vmem:[#allocation2 + $0x18] sm:$0xff] }
 0x119   : > { %803 = vmatpush.msra.mxu2 %v503_v41  ;;  %804 = vmatpush.msra.mxu3 %v503_v41  ;;  %v497_v44 = vld [vmem:[#allocation2 + $0x20] sm:$0xff]  ;;  %s1898_s24 = sld [smem:[#allocation41_spill]] }
 0x11a   : > { %547 = vmatpush.msra.mxu0 %v503_v41  ;;  %802 = vmatpush.msra.mxu1 %v503_v41  ;;  %v498_v48 = vld [vmem:[#allocation2 + $0x28] sm:$0xff]  ;;  %v1021_v52 = vld [vmem:[%s405_s13] ss:$0 sm:$0xff]  ;;  %s600_s13 = sshll.u32 %s1684_s0, 4  ;;  %s601_s13 = int_to_ptr.vmem [resolvable:$true] %s600_s13 }
 0x11b   : > { %806 = vmatpush.msra.mxu2 %v502_v42  ;;  %807 = vmatpush.msra.mxu3 %v502_v42  ;;  %v499_v45 = vld [vmem:[#allocation2 + $0x30] sm:$0xff] }
 0x11c   : > { %548 = vmatpush.msra.mxu0 %v502_v42  ;;  %805 = vmatpush.msra.mxu1 %v502_v42  ;;  %v500_v49 = vld [vmem:[#allocation2 + $0x38] sm:$0xff]  ;;  %s798_s20 = sshll.u32 %s1894_s6, 4 }
 0x11d   : > { %809 = vmatpush.msra.mxu2 %v501_v43  ;;  %810 = vmatpush.msra.mxu3 %v501_v43  ;;  %s595_s30 = sadd.s32 %s1895_s29, %s798_s20 }
 0x11e   : > { %787 = vmatmul.msk.f32.vlgmr.msra.gmra.mxu2 %vm509_vm1, %v497_v44  ;;  %789 = vmatmul.msk.f32.vlgmr.msra.gmra.mxu3 %vm509_vm1, %v499_v45  ;;  %s794_s27 = sshll.u32 %s1896_s18, 5 }
 0x11f   : > { %549 = vmatpush.msra.mxu0 %v501_v43  ;;  %808 = vmatpush.msra.mxu1 %v501_v43  ;;  %s597_s11 = sadd.s32 %s794_s27, %s595_s30  ;;  %s1899_s5 = smov %s1898_s24 }
 0x120   : > { %783 = vmatmul.msk.f32.vlgmr.msra.gmra.mxu0 %vm509_vm1, %v493_v46  ;;  %785 = vmatmul.msk.f32.vlgmr.msra.gmra.mxu1 %vm509_vm1, %v495_v47  ;;  %s795_s8 = sshll.u32 %s597_s11, 3  ;;  %s1162_s21 = scalar_lea.hbm %s1899_s5, 512 }
 0x121   : > { %s599_s23 = scalar_lea.hbm %s1898_s24, %s795_s8 }
 0x122   : > { %s602_s3 = sshll.u32 %s599_s23, 4  ;;  %s603_s3 = int_to_ptr.hbm [resolvable:$true] %s602_s3 }
 0x123   : > { %s1156_s6 = sshra.s32 %s603_s3, 4  ;;  %s1157_s6 = int_to_ptr.hbm [resolvable:$true] %s1156_s6 }
 0x124   : > { %s1158_s29 = scalar_lea.hbm %s1157_s6, 64  ;;  %p1163_p8 = scmp.lt.s32.totalorder %s1157_s6, %s1899_s5 }
 0x125   : > { %p1159_p11 = scmp.ne.s32.totalorder %s1157_s6, %s1158_s29  ;;  %p1164_p12 = scmp.lt.s32.totalorder %s1162_s21, %s1158_s29 }
 0x126   : > { %788 = vmatmul.msk.f32.gmra.mxu2 %vm509_vm1, %v498_v48  ;;  %790 = vmatmul.msk.f32.gmra.mxu3 %vm509_vm1, %v500_v49 }
 0x127   : > { %p1160_p3 = pnand %p1159_p11, %p1573_p9  ;;  %p1165_p6 = por %p1164_p12, %p1163_p8 }
 0x128   : > { %784 = vmatmul.msk.f32.gmra.mxu0 %vm509_vm1, %v494_v50  ;;  %786 = vmatmul.msk.f32.gmra.mxu1 %vm509_vm1, %v496_v51 }
 0x129   : > { %p1161_p5 = pneg %p1160_p3 }
 0x12b   : > { %p1166_p7 = pnand %p1165_p6, %p1161_p5 }
 0x19d   : > { %v551_v53 = vpop.f32.mrf.mxu0  ;;  %v557_v54 = vpop.f32.mrf.mxu1 }
 0x19e   : > { %v552_v55 = vadd.f32 %v1021_v52, %v551_v53  ;;  %v558_v56 = vadd.f32 %v1021_v52, %v557_v54 }
 0x1a0   : > { %575 = vst [vmem:[%s1684_s0] sm:$0xff] %v552_v55 }
 0x1a1   : > { %577 = vst [vmem:[%s1684_s0 + $0x10] sm:$0xff] %v558_v56  ;;  %v563_v57 = vpop.f32.mrf.mxu2  ;;  %v569_v58 = vpop.f32.mrf.mxu3 }
 0x1a2   : > { %v564_v59 = vadd.f32 %v1021_v52, %v563_v57  ;;  %v570_v60 = vadd.f32 %v1021_v52, %v569_v58 }
 0x1a4   : > { %579 = vst [vmem:[%s1684_s0 + $0x20] sm:$0xff] %v564_v59 }
 0x1a5   : > { %581 = vst [vmem:[%s1684_s0 + $0x30] sm:$0xff] %v570_v60  ;;  %v554_v61 = vpop.f32.mrf.mxu0  ;;  %v560_v62 = vpop.f32.mrf.mxu1 }
 0x1a6   : > { %v555_v63 = vadd.f32 %v1021_v52, %v554_v61  ;;  %v561_v0 = vadd.f32 %v1021_v52, %v560_v62 }
 0x1a8   : > { %576 = vst [vmem:[%s1684_s0 + $0x8] sm:$0xff] %v555_v63 }
 0x1a9   : > { %578 = vst [vmem:[%s1684_s0 + $0x18] sm:$0xff] %v561_v0  ;;  %v566_v1 = vpop.f32.mrf.mxu2  ;;  %v572_v2 = vpop.f32.mrf.mxu3 }
 0x1aa   : > { %v567_v3 = vadd.f32 %v1021_v52, %v566_v1  ;;  %v573_v4 = vadd.f32 %v1021_v52, %v572_v2 }
 0x1ac   : > { %580 = vst [vmem:[%s1684_s0 + $0x28] sm:$0xff] %v567_v3 }
 0x1ad   : > { %582 = vst [vmem:[%s1684_s0 + $0x38] sm:$0xff] %v573_v4 }
 0x1ae   : > { %1169 = shalt.err (!%p1166_p7)
}
 0x1af   : > { %s1346_s17 = smov 128   ;;  %s1347_s0 = smov 256  }
 0x1b0   : > { %s1348_s30 = smov 8  }
 0x1b1   : > { %821 = dma.vmem_to_hbm [thread:$0]  (%p1573_p9), %s601_s13, 1024, %s603_s3, %s584_s14, %s1346_s17, %s1347_s0, %s1348_s30  }
 0x1b2 PF: > { %s1902_s27 = sld [smem:[#allocation17_spill]]  ;;  %p844_p2 = scmp.ge.s32.totalorder %s1340_s15, 2 }
 0x1b4   : > { %p838_p4 = pnand %p844_p2, %p1581_p1 }
 0x1b6   : > { %p839_p13 = pneg %p838_p4 }
 0x1b8   : > { %s617_s8 = sand.u32 1, %s1902_s27  }
 0x1b9   : > { %s618_s10 = scalar_lea.sflag [#allocation5], %s617_s8 }
 0x1ba   : > { %1263 = dma.done.wait (%p839_p13), %s618_s10, 1024  }
 0x1bb   : > { %1265 = vsyncadd (%p839_p13), %s618_s10, 4294966272  ;;  %s28_s15 = sadd.s32 1, %s1340_s15   ;;  %s1905_s21 = sld [smem:[#allocation18_spill]] }
 0x1bc   : > { %p1752_p10 = scmp.ge.s32.totalorder %s28_s15, 10   ;;  %s1906_s22 = sld [smem:[#allocation19_spill]] }
 0x1bd   : > { %s1907_s23 = sld [smem:[#allocation33_spill]]  ;;  %s1918_s24 = smov %s1284_s25 }
 0x1be   : > { %s1908_s19 = sld [smem:[#allocation31_spill]]  ;;  %s1919_s25 = smov %s1288_s26 }
 0x1bf   : > { %s1909_s13 = sld [smem:[#allocation20_spill]]  ;;  %s1921_s27 = smov %s1296_s28 }
 0x1c0   : > { %s1910_s29 = sld [smem:[#allocation36_spill]]  ;;  %s1923_s30 = smov %s1308_s7 }
 0x1c1   : > { %s1911_s3 = sld [smem:[#allocation21_spill]]  ;;  %s1925_s9 = smov %s1328_s12 }
 0x1c2   : > { %s1912_s8 = sld [smem:[#allocation32_spill]] }
 0x1c3   : > { %s1913_s10 = sld [smem:[#allocation25_spill]] }
 0x1c4   : > { %s1914_s11 = sld [smem:[#allocation26_spill]]  ;;  %s1920_s26 = smov %s1908_s19 }
 0x1c5   : > { %s1915_s14 = sld [smem:[#allocation27_spill]]  ;;  %s1922_s28 = smov %s1909_s13 }
 0x1c6   : > { %s1916_s6 = sld [smem:[#allocation28_spill]] }
 0x1c7   : > { %s1917_s18 = sld [smem:[#allocation30_spill]]  ;;  %s1924_s7 = smov %s1911_s3 }
 0x1c9   :  { %27 = sbr.rel (!%p1752_p10) target bundleno = 23 (0x17), region = 126 }
 0x1cb   : > { %s1926_s12 = smov %s1915_s14 }
 0x1cc   : > { %s1927_s13 = smov %s1916_s6 }
 0x1cd   : > { %s1928_s14 = smov %s1917_s18 }
 0x1ce   :  { %624 = vsyncpa [#allocation4], 1 }
 0x1cf   :  { %626 = vsyncpa [#allocation4 + $0x1], 1 }
 0x1d0   :  { %627 = vsyncpa [#allocation7], 1 }
 0x1d1   :  { %629 = vsyncpa [#allocation7 + $0x1], 1 }
 0x1d2   :  { %630 = vsyncpa [#allocation10], 1 }
 0x1d3   :  { %632 = vsyncpa [#allocation10 + $0x1], 1 }
 0x1d4   :  { %633 = vsyncpa [#allocation5], 1 }
 0x1d5   :  { %635 = vsyncpa [#allocation5 + $0x1], 1 }

</bundles_post_ra>
